<compile_context>
chip_gen: v7x
topology: tpu7x:2x2x1
jax: 0.10.0
libtpu: 0.0.40
codegen_flags: <defaults>
</compile_context>

<pallas_src>
import math
import functools

import jax
import jax.numpy as jnp
from jax import lax
from jax.experimental import pallas as pl
from jax.experimental.pallas import tpu as pltpu


_TOK_BLOCK = 256                    # tokens per grid step (v7x-safe even at D=4096 f32)
_NRING = 8                          # outstanding row DMAs in the large-table path
_SMALL_TABLE_BYTES = 4 * 1024 * 1024  # tables <= this live fully in VMEM


def _round_up(x, m):
    return ((x + m - 1) // m) * m


def _gather_vmem_kernel(tok_ref, table_ref, out_ref, *, tok_block):
    """Small-table path: whole pre-scaled table resident in VMEM; gather rows
    with dynamic sublane indexing. Pure gather -- no arithmetic."""
    base = pl.program_id(0) * tok_block

    def body(r, carry):
        tok = tok_ref[base + r]                               # scalar read from SMEM
        out_ref[pl.ds(r, 1), :] = table_ref[pl.ds(tok, 1), :]
        return carry

    lax.fori_loop(0, tok_block, body, 0)


def _gather_dma_kernel(tok_ref, table_hbm, out_ref, row_buf, sem, *,
                       tok_block, nring):
    """Large-table path: per-row async DMA gather HBM -> VMEM scratch with a
    ring of `nring` copies in flight, then one block-wide store to the output."""
    base = pl.program_id(0) * tok_block

    def issue(r):
        tok = tok_ref[base + r]
        pltpu.make_async_copy(
            table_hbm.at[pl.ds(tok, 1), :],
            row_buf.at[pl.ds(r, 1), :],
            sem.at[r % nring],
        ).start()

    def wait(r):
        # Same-shaped descriptor; only the semaphore slot matters for the wait.
        pltpu.make_async_copy(
            table_hbm.at[pl.ds(0, 1), :],
            row_buf.at[pl.ds(0, 1), :],
            sem.at[r % nring],
        ).wait()

    # Prime the ring: first `nring` row gathers all in flight at once.
    for r in range(min(nring, tok_block)):
        issue(r)

    # Steady state: retire the oldest outstanding copy, reuse its slot.
    def steady(r, carry):
        wait(r - nring)
        issue(r)
        return carry

    lax.fori_loop(nring, tok_block, steady, 0)

    # Drain the ring.
    for r in range(max(0, tok_block - nring), tok_block):
        wait(r)

    # One block-wide store; the pipeline writes this (tok_block, D) tile back
    # to HBM while the next block's row gathers are already being issued.
    out_ref[...] = row_buf[...]


def token_embedding(tokens, embedding_table, *, tok_block=_TOK_BLOCK,
                    force_dma_gather=False):
    """embedding_table[tokens] * sqrt(D) via a Pallas gather kernel."""
    V, D = embedding_table.shape
    lead_shape = tokens.shape
    N = int(tokens.size)
    tok_flat = tokens.reshape(N).astype(jnp.int32)

    # Fold sqrt(D) into the table once -> the kernel is a pure gather.
    table_scaled = embedding_table * jnp.asarray(math.sqrt(D), embedding_table.dtype)

    # Tokens per grid step: multiple of 8 sublanes, no bigger than needed.
    tok_block = max(8, min(tok_block, _round_up(N, 8)))
    tok_block = _round_up(tok_block, 8)
    n_pad = _round_up(N, tok_block)
    if n_pad != N:
        tok_flat = jnp.pad(tok_flat, (0, n_pad - N))  # pad with token id 0 (valid row)
    n_blocks = n_pad // tok_block

    table_bytes = V * D * jnp.dtype(embedding_table.dtype).itemsize
    use_vmem_table = (table_bytes <= _SMALL_TABLE_BYTES) and not force_dma_gather

    compiler_params = pltpu.CompilerParams(
        dimension_semantics=("parallel",),      # token blocks are independent (2 TCs on v7x)
        vmem_limit_bytes=32 * 1024 * 1024,      # explicit; blocks sized for v7x's smaller VMEM
    )
    out_shape = jax.ShapeDtypeStruct((n_pad, D), table_scaled.dtype)

    if use_vmem_table:
        kernel = functools.partial(_gather_vmem_kernel, tok_block=tok_block)
        grid_spec = pltpu.PrefetchScalarGridSpec(
            num_scalar_prefetch=1,              # token ids land in SMEM
            grid=(n_blocks,),
            in_specs=[pl.BlockSpec((V, D), lambda i, tok: (0, 0))],   # whole table in VMEM
            out_specs=pl.BlockSpec((tok_block, D), lambda i, tok: (i, 0)),
        )
    else:
        nring = min(_NRING, tok_block)
        kernel = functools.partial(_gather_dma_kernel, tok_block=tok_block, nring=nring)
        grid_spec = pltpu.PrefetchScalarGridSpec(
            num_scalar_prefetch=1,
            grid=(n_blocks,),
            in_specs=[pl.BlockSpec(memory_space=pl.ANY)],             # table stays in HBM
            out_specs=pl.BlockSpec((tok_block, D), lambda i, tok: (i, 0)),
            scratch_shapes=[
                pltpu.VMEM((tok_block, D), table_scaled.dtype),
                pltpu.SemaphoreType.DMA((nring,)),
            ],
        )

    out_flat = pl.pallas_call(
        kernel,
        out_shape=out_shape,
        grid_spec=grid_spec,
        compiler_params=compiler_params,
    )(tok_flat, table_scaled)

    return out_flat[:N].reshape(*lead_shape, D)


if __name__ == "__main__":
    key = jax.random.PRNGKey(0)
    k_emb, k_tok = jax.random.split(key)

    vocab_size = 50
    embedding_dim = 32
    batch, seq = 2, 8

    # Deterministic "parameters" (stand-in for nn.Embedding.weight ~ N(0, 1)).
    embedding_table = jax.random.normal(
        k_emb, (vocab_size, embedding_dim), dtype=jnp.float32
    )
    tokens = jax.random.randint(k_tok, (batch, seq), 0, vocab_size, dtype=jnp.int32)

    ref = embedding_table[tokens] * math.sqrt(embedding_dim)

    # Small-vocab fast path (whole pre-scaled table resident in VMEM).
    out = jax.block_until_ready(token_embedding(tokens, embedding_table))
    assert out.shape == (batch, seq, embedding_dim)
    assert jnp.allclose(out, ref, atol=1e-6, rtol=1e-6)

    # Large-vocab path (forced): per-row async-DMA gather with a ring of
    # outstanding copies into a VMEM scratch block.
    out_dma = jax.block_until_ready(
        token_embedding(tokens, embedding_table, force_dma_gather=True)
    )
    assert jnp.allclose(out_dma, ref, atol=1e-6, rtol=1e-6)

    print("KERNEL_OK")
</pallas_src>

<mosaic_0001>
module attributes {stable_mosaic.version = 11 : i64} {
  func.func @_gather_vmem_kernel(%arg0: i32, %arg1: memref<16xi32, #tpu.memory_space<smem>>, %arg2: memref<50x32xf32, #tpu.memory_space<vmem>>, %arg3: memref<16x32xf32, #tpu.memory_space<vmem>>) attributes {dimension_semantics = [#tpu.dimension_semantics<parallel>], iteration_bounds = array<i64: 1>, scalar_prefetch = 1 : i64, scratch_operands = 0 : i64, tpu.core_type = #tpu.core_type<tc>, window_params = [{pipeline_mode = #tpu.pipeline_mode<synchronous>, transform_indices = @transform_0, window_bounds = array<i64: 50, 32>}, {transform_indices = @transform_1, window_bounds = array<i64: 16, 32>}]} {
    %c16_i32 = arith.constant 16 : i32
    %0 = arith.muli %arg0, %c16_i32 : i32
    %c0_i32 = arith.constant 0 : i32
    %c16_i32_0 = arith.constant 16 : i32
    %1 = arith.addi %c0_i32, %c16_i32_0 : i32
    %c1_i32 = arith.constant 1 : i32
    scf.for %arg4 = %c0_i32 to %1 step %c1_i32  : i32 {
      %2 = arith.addi %0, %arg4 : i32
      %3 = arith.index_cast %2 : i32 to index
      %4 = memref.load %arg1[%3] : memref<16xi32, #tpu.memory_space<smem>>
      %5 = arith.index_cast %4 : i32 to index
      %c0 = arith.constant 0 : index
      %6 = vector.load %arg2[%5, %c0] : memref<50x32xf32, #tpu.memory_space<vmem>>, vector<1x32xf32>
      %7 = arith.index_cast %arg4 : i32 to index
      %c0_2 = arith.constant 0 : index
      %8 = vector.load %arg3[%7, %c0_2] : memref<16x32xf32, #tpu.memory_space<vmem>>, vector<1x32xf32>
      tpu.vector_store %arg3[%7, %c0_2], %6 {strides = array<i32>} : memref<16x32xf32, #tpu.memory_space<vmem>>, vector<1x32xf32>,
    }
    %c16_i32_1 = arith.constant 16 : i32
    return
  }
  func.func @transform_0(%arg0: i32, %arg1: memref<16xi32, #tpu.memory_space<smem>>) -> (i32, i32) {
    %c0_i32 = arith.constant 0 : i32
    %c0_i32_0 = arith.constant 0 : i32
    %c0_i32_1 = arith.constant 0 : i32
    return %c0_i32, %c0_i32_0 : i32, i32
  }
  func.func @transform_1(%arg0: i32, %arg1: memref<16xi32, #tpu.memory_space<smem>>) -> (i32, i32) {
    %c0_i32 = arith.constant 0 : i32
    %c0_i32_0 = arith.constant 0 : i32
    return %arg0, %c0_i32 : i32, i32
  }
}

</mosaic_0001>

<bundles_post_ra>
// kernel: tpu_custom_call.1
= control target key start
LH: loop header
LB: loop body
LE: loop exit
PB: predicated region body
PF: predicated region fallthrough
CT: control target
= control target key end

     0   :  { %s148_s0 = inlined_call_operand.vmem [shape: s32[16], index: 0, kind: input, shape index: {}]   ;;  %s149_s1 = inlined_call_operand.vmem [shape: f32[50,32], index: 1, kind: input, shape index: {}]   ;;  %s150_s2 = inlined_call_operand.hbm [shape: f32[16,32], index: 2, kind: output, shape index: {}]  }
   0x1   :  { %s7_s11 = sshll.u32 %s148_s0, 4  ;;  %s8_s11 = int_to_ptr.vmem [resolvable:$true] %s7_s11 }
   0x2   :  { %s65_s12 = scalar_lea.vmem %s8_s11, 16  ;;  %p70_p1 = scmp.lt.s32.totalorder %s8_s11, %s8_s11 }
   0x3   :  { %p66_p0 = scmp.ne.s32.totalorder %s8_s11, %s65_s12  ;;  %p71_p2 = scmp.lt.s32.totalorder %s65_s12, %s65_s12 }
   0x5   :  { %p72_p3 = por %p71_p2, %p70_p1 }
   0x7   :  { %p73_p4 = pnand %p72_p3, %p66_p0 }
   0x9   :  { %76 = shalt.err (!%p73_p4)  }
   0xa   :  { %s111_s13 = smov [#allocation3]  }
   0xb   :  { %10 = dma.vmem_to_smem %s8_s11, 16, %s111_s13, [#allocation2] }
   0xc   :  { %103 = dma.done.wait [#allocation2], 16 }
   0xd   :  { %104 = vsyncadd [#allocation2], 4294967280 }
   0xe   :  { %12 = sfence }
   0xf   :  { %13 = vsyncpa [#allocation5], 0  ;;  %s107_s14 = smov 0  }
  0x10 LB: > { %s24_s15 = sld [smem:[#allocation3 + %s109_s14]]  ;;  %vm28_vm0 = vcmask 253952   ;;  %s27_s18 = scalar_lea.vmem [#allocation4], %s109_s14  ;;  %s109_s14 = sphi %s107_s14, %s22_s14  }
  0x11   : > { %s22_s14 = sadd.s32 1, %s109_s14  }
  0x12   : > { %p19_p5 = scmp.ge.s32.totalorder %s22_s14, 16  }
  0x13   :  { %s112_s19 = smov (%p19_p5), [#allocation4]  }
  0x14   :  { %21 = sbr.rel (!%p19_p5) target bundleno = 16 (0x10), region = 33  ;;  %s35_s20 = sshll.u32 (%p19_p5), %s112_s19, 4  ;;  %s36_s20 = int_to_ptr.vmem [resolvable:$true] %s35_s20 }
  0x15   :  { %s77_s21 = scalar_lea.vmem (%p19_p5), %s36_s20, 256  ;;  %p82_p7 = scmp.lt.s32.totalorder (%p19_p5), %s36_s20, %s36_s20 }
  0x16   : > { %s25_s17 = scalar_lea.vmem %s149_s1, %s24_s15  ;;  %p78_p6 = scmp.ne.s32.totalorder (%p19_p5), %s36_s20, %s77_s21 }
  0x17   : > { %v26_v0 = vld [vmem:[%s25_s17] sm:$0x1]  ;;  %p83_p8 = scmp.lt.s32.totalorder (%p19_p5), %s77_s21, %s77_s21 }
  0x18   : > { %29 = vst.msk [vmem:[%s27_s18] sm:$0x1] %vm28_vm0, %v26_v0 }
  0x19   :  { %p84_p9 = por (%p19_p5), %p83_p8, %p82_p7 }
  0x1b   :  { %p85_p10 = pnand %p84_p9, %p78_p6 }
  0x1d   :  { %88 = shalt.err (!%p85_p10)
}
  0x1e   :  { %s89_s24 = scalar_lea.hbm %s150_s2, 256 }
  0x1f   :  { %p90_p11 = scmp.ne.s32.totalorder %s150_s2, %s89_s24  ;;  %p93_p12 = scmp.lt.u32.totalorder %s89_s24, %s150_s2 }
  0x21   :  { %p95_p13 = pnand %p93_p12, %p90_p11 }
  0x23   :  { %98 = shalt.err (!%p95_p13)
}
  0x24   :  { %s113_s1 = smov 128   ;;  %s114_s29 = smov 8  }
  0x25   :  { %41 = dma.vmem_to_hbm [thread:$0]  %s36_s20, 256, %s150_s2, [#allocation5], %s113_s1, %s113_s1, %s114_s29  }
  0x26   :  { %105 = dma.done.wait [#allocation5], 256  }
  0x27   :  { %106 = vsyncadd [#allocation5], 4294967040 }
  0x28   :  { %45 = vsyncpa [#allocation5], 1 }

</bundles_post_ra>
